<compile_context>
chip_gen: v7x
topology: tpu7x:2x2x1
jax: 0.10.0
libtpu: 0.0.40
codegen_flags: <defaults>
</compile_context>

<pallas_src>
import functools
import numpy as np
import jax
import jax.numpy as jnp
from jax.experimental import pallas as pl
from jax.experimental.pallas import tpu as pltpu


_LANE = 128


def _round_up(x, m):
    return ((x + m - 1) // m) * m


def _vmem_limit_bytes():
    """Generation-aware scoped-VMEM limit (leaves headroom for compiler scratch)."""
    phys = 64 * 1024 * 1024                 # conservative default (= v7x physical)
    try:
        info = pltpu.get_tpu_info()
        phys = int(getattr(info, "vmem_capacity_bytes", phys))
    except Exception:
        pass
    # ~75% of physical: v7x -> 48 MiB, v5e/v6e -> 96 MiB.
    return max(32 * 1024 * 1024, min(phys * 3 // 4, 96 * 1024 * 1024))


def _pick_tiles(n):
    """Padded node count and (row, contraction) tile size for the NxN adjacency.

    Padding is decoupled from tile size: pick the tile minimizing
    (padded M bytes) + (per-grid-step overhead) so awkward N are not inflated
    to the next 512/1024 boundary unless the larger tile actually wins.
    """
    npad_min = _round_up(max(n, 1), _LANE)
    if npad_min <= 1024:
        return npad_min, npad_min, npad_min          # single M tile
    step_overhead_bytes = 512 * 1024                 # ~0.35us of HBM BW per step
    best = None
    for tile in (1024, 512, 256):
        npad = _round_up(n, tile)
        steps = (npad // tile) ** 2
        cost = 2 * npad * npad + steps * step_overhead_bytes
        if best is None or cost < best[0]:
            best = (cost, npad, tile)
    _, npad, tile = best
    return npad, tile, tile


# ------------------------- Pallas kernels -------------------------

def _fused_forward_kernel(m_ref, x_ref, w1_ref, b1_ref, w2_ref, b2_ref, o_ref):
    # Whole graph resident in VMEM: M is loaded from HBM exactly once and
    # reused by both aggregation passes; XW1 / h / XW2 never touch HBM.
    # Intermediates are cast to bf16 before each MXU matmul (f32 accumulation).
    xw1 = jnp.dot(x_ref[...], w1_ref[...],
                  preferred_element_type=jnp.float32).astype(jnp.bfloat16)
    h = jnp.maximum(jnp.dot(m_ref[...], xw1,
                            preferred_element_type=jnp.float32) + b1_ref[...], 0.0)
    xw2 = jnp.dot(h.astype(jnp.bfloat16), w2_ref[...],
                  preferred_element_type=jnp.float32).astype(jnp.bfloat16)
    o_ref[...] = (jnp.dot(m_ref[...], xw2, preferred_element_type=jnp.float32)
                  + b2_ref[...]).astype(o_ref.dtype)


def _transform_kernel(x_ref, w_ref, o_ref):
    # Feature transform row-tile: (tm, Fin) @ (Fin, Fout) on the MXU,
    # f32 accumulation, bf16 lane-dense output.
    o_ref[...] = jnp.dot(x_ref[...], w_ref[...],
                         preferred_element_type=jnp.float32).astype(o_ref.dtype)


def _aggregate_kernel(m_ref, xw_ref, b_ref, o_ref, acc_ref, *,
                      tk, resident_xw, apply_relu):
    # out[i] = sum_k M[i, k] @ XW[k]  (+ bias, optional ReLU at finalize).
    k = pl.program_id(1)

    @pl.when(k == 0)
    def _():
        acc_ref[...] = jnp.zeros_like(acc_ref)

    if resident_xw:
        # XW is fully VMEM-resident (constant index map); slice the k-chunk.
        xw = xw_ref[pl.ds(pl.multiple_of(k * tk, tk), tk), :]
    else:
        xw = xw_ref[...]
    acc_ref[...] += jnp.dot(m_ref[...], xw, preferred_element_type=jnp.float32)

    @pl.when(k == pl.num_programs(1) - 1)
    def _():
        out = acc_ref[...] + b_ref[...]           # b is (1, Fout), broadcasts
        if apply_relu:
            out = jnp.maximum(out, 0.0)
        o_ref[...] = out.astype(o_ref.dtype)


def _aggregate_transform_kernel(m_ref, xw_ref, b_ref, wn_ref, o_ref, acc_ref, *,
                                tk, resident_xw):
    # Fused conv1-aggregate + ReLU + conv2-feature-transform:
    #   h_tile = relu(M[i,:] @ XW1 + b1);  o_tile = h_tile @ W2   (h stays on-chip)
    # NOTE: padded rows (i >= N) of the output hold relu(b1) @ W2 (the bias
    # leaks into zero-accumulated padded rows).  Harmless because M's padded
    # columns are zero; never consume this output unsliced elsewhere.
    k = pl.program_id(1)

    @pl.when(k == 0)
    def _():
        acc_ref[...] = jnp.zeros_like(acc_ref)

    if resident_xw:
        xw = xw_ref[pl.ds(pl.multiple_of(k * tk, tk), tk), :]
    else:
        xw = xw_ref[...]
    acc_ref[...] += jnp.dot(m_ref[...], xw, preferred_element_type=jnp.float32)

    @pl.when(k == pl.num_programs(1) - 1)
    def _():
        h = jnp.maximum(acc_ref[...] + b_ref[...], 0.0).astype(wn_ref.dtype)
        o_ref[...] = jnp.dot(h, wn_ref[...],
                             preferred_element_type=jnp.float32).astype(o_ref.dtype)


# ------------------------- pallas_call wrappers -------------------------

def fused_forward(m, x, w1, b1, w2, b2, *, out_dtype, vmem_limit):
    """Single-call whole-graph forward (M resident across both layers)."""
    n = m.shape[0]
    fin, hid = w1.shape
    cpad = w2.shape[1]
    return pl.pallas_call(
        _fused_forward_kernel,
        out_shape=jax.ShapeDtypeStruct((n, cpad), out_dtype),
        compiler_params=pltpu.CompilerParams(vmem_limit_bytes=vmem_limit),
        cost_estimate=pl.CostEstimate(
            flops=2 * n * (fin * hid + n * hid + hid * cpad + n * cpad),
            transcendentals=0,
            bytes_accessed=(2 * (n * n + n * fin + fin * hid + hid * cpad)
                            + 4 * n * cpad)),
    )(m, x, w1, b1, w2, b2)


def feature_transform(x, w, *, tm, vmem_limit):
    """XW = X @ W, tiled over rows of X. x:[Npad,Fin] bf16, w:[Fin,Fout] bf16."""
    n, fin = x.shape
    fout = w.shape[1]
    return pl.pallas_call(
        _transform_kernel,
        out_shape=jax.ShapeDtypeStruct((n, fout), jnp.bfloat16),
        grid=(n // tm,),
        in_specs=[
            pl.BlockSpec((tm, fin), lambda i: (i, 0)),
            pl.BlockSpec((fin, fout), lambda i: (0, 0)),
        ],
        out_specs=pl.BlockSpec((tm, fout), lambda i: (i, 0)),
        compiler_params=pltpu.CompilerParams(
            dimension_semantics=("parallel",),
            vmem_limit_bytes=vmem_limit),
        cost_estimate=pl.CostEstimate(
            flops=2 * n * fin * fout,
            transcendentals=0,
            bytes_accessed=2 * (n * fin + fin * fout + n * fout)),
    )(x, w)


def aggregate(m, xw, b, *, tm, tk, apply_relu, out_dtype, vmem_limit, w_next=None):
    """out = M @ XW + b (ReLU optional).  If w_next is given, additionally fuse
    the next layer's feature transform: out = relu(M @ XW + b) @ w_next."""
    n = m.shape[0]
    fout = xw.shape[1]
    f_o = fout if w_next is None else w_next.shape[1]

    # The kernel is HBM-bound on streaming M; a k-indexed XW spec re-fetches the
    # whole XW array once per row tile.  Keep XW fully VMEM-resident when the
    # working set fits; otherwise fall back to the streamed spec.
    resident_bytes = (2 * n * fout                     # resident XW (bf16)
                      + 2 * 2 * tm * tk                # double-buffered M tile
                      + 4 * tm * fout                  # f32 accumulator scratch
                      + 2 * 4 * tm * f_o               # double-buffered out tile
                      + (0 if w_next is None else 2 * fout * f_o))
    resident_xw = resident_bytes <= (vmem_limit * 3) // 4

    if resident_xw:
        xw_spec = pl.BlockSpec((n, fout), lambda i, k: (0, 0))     # fetched once
    else:
        xw_spec = pl.BlockSpec((tk, fout), lambda i, k: (k, 0))    # streamed

    in_specs = [
        pl.BlockSpec((tm, tk), lambda i, k: (i, k)),               # M tile
        xw_spec,
        pl.BlockSpec((1, fout), lambda i, k: (0, 0)),              # bias, resident
    ]
    operands = [m, xw, b]

    if w_next is None:
        kernel = functools.partial(_aggregate_kernel, tk=tk,
                                   resident_xw=resident_xw, apply_relu=apply_relu)
        extra_flops = 0
    else:
        kernel = functools.partial(_aggregate_transform_kernel, tk=tk,
                                   resident_xw=resident_xw)        # ReLU always applied
        in_specs.append(pl.BlockSpec((fout, f_o), lambda i, k: (0, 0)))
        operands.append(w_next)
        extra_flops = 2 * n * fout * f_o

    bytes_acc = (n * n * m.dtype.itemsize
                 + n * fout * xw.dtype.itemsize
                 + n * f_o * jnp.dtype(out_dtype).itemsize)

    return pl.pallas_call(
        kernel,
        out_shape=jax.ShapeDtypeStruct((n, f_o), out_dtype),
        grid=(n // tm, n // tk),
        in_specs=in_specs,
        out_specs=pl.BlockSpec((tm, f_o), lambda i, k: (i, 0)),
        scratch_shapes=[pltpu.VMEM((tm, fout), jnp.float32)],
        compiler_params=pltpu.CompilerParams(
            dimension_semantics=("parallel", "arbitrary"),
            vmem_limit_bytes=vmem_limit),
        cost_estimate=pl.CostEstimate(
            flops=2 * n * n * fout + extra_flops,
            transcendentals=0,
            bytes_accessed=bytes_acc),
    )(*operands)


# ------------------------- glue (plain JAX) -------------------------

def build_norm_adj(edge_index, num_nodes, npad=None, out_dtype=jnp.float32):
    """Dense equivalent of gcn_norm (edge_index branch) + add-aggregation,
    built directly in its final (transposed, normalized, padded) form.

    Returns M[t, s] = A_hat[s, t] / deg[t], deg[t] = sum_s A_hat[s, t],
    allocated at (npad, npad) and cast to out_dtype (padded rows/cols zero).
    """
    if npad is None:
        npad = num_nodes
    src, dst = edge_index[0], edge_index[1]
    At = jnp.zeros((npad, npad), jnp.float32)
    At = At.at[dst, src].add(1.0)                     # At[target, source]
    # add_remaining_self_loops (fill 1.0) for real nodes without a self loop.
    diag = jnp.diag(At)
    is_node = jnp.arange(npad) < num_nodes
    At = At + jnp.diag(jnp.where(is_node & (diag == 0), 1.0, 0.0))
    deg = At.sum(axis=1)                              # scatter_add over col (target)
    deg_inv = jnp.where(deg > 0, 1.0 / deg, 0.0)      # norm = w / deg[col]
    return (At * deg_inv[:, None]).astype(out_dtype)


def _pad2(a, rows, cols, dtype):
    out = jnp.zeros((rows, cols), dtype)
    return out.at[:a.shape[0], :a.shape[1]].set(a.astype(dtype))


def stand_gcn2_forward(x, edge_index, params, mode="auto"):
    """StandGCN2.forward (has_discriminator=False, eval mode).

    mode: "auto" (fused single kernel if it fits VMEM, else tiled),
          "fused", or "tiled".
    """
    (W1, b1), (W2, b2) = params
    N, nfeat = x.shape
    nhid = W1.shape[1]
    nclass = W2.shape[1]

    fpad = _round_up(nfeat, _LANE)
    hpad = _round_up(nhid, _LANE)
    cpad = _round_up(nclass, _LANE)
    vmem_limit = _vmem_limit_bytes()

    # ---- fully-fused single-call path (small/medium graphs) ----
    npad_f = _round_up(N, _LANE)
    fused_bytes = (2 * npad_f * npad_f                # M (bf16)
                   + 2 * npad_f * fpad                # X (bf16)
                   + 2 * fpad * hpad + 2 * hpad * cpad
                   + 4 * npad_f * cpad                # output (f32)
                   + 12 * npad_f * max(hpad, cpad))   # in-kernel intermediates
    use_fused = (mode == "fused") or (mode == "auto" and fused_bytes <= vmem_limit // 2)

    if use_fused:
        npad = npad_f
    else:
        npad, tm, tk = _pick_tiles(N)

    M_p = build_norm_adj(edge_index, N, npad, jnp.bfloat16)
    x_p = _pad2(x, npad, fpad, jnp.bfloat16)
    W1_p = _pad2(W1, fpad, hpad, jnp.bfloat16)
    W2_p = _pad2(W2, hpad, cpad, jnp.bfloat16)
    b1_p = _pad2(b1.reshape(1, -1), 1, hpad, jnp.float32)
    b2_p = _pad2(b2.reshape(1, -1), 1, cpad, jnp.float32)

    if use_fused:
        out = fused_forward(M_p, x_p, W1_p, b1_p, W2_p, b2_p,
                            out_dtype=jnp.float32, vmem_limit=vmem_limit)
        return out[:N, :nclass]

    # ---- tiled path (large graphs) ----
    # conv1 feature transform: XW1 = X @ W1
    xw1 = feature_transform(x_p, W1_p, tm=tm, vmem_limit=vmem_limit)
    # conv1 aggregation + ReLU fused with conv2 feature transform:
    #   XW2 = relu(M @ XW1 + b1) @ W2     (hidden h stays on-chip)
    xw2 = aggregate(M_p, xw1, b1_p, tm=tm, tk=tk, apply_relu=True,
                    out_dtype=jnp.bfloat16, vmem_limit=vmem_limit, w_next=W2_p)
    # conv2 aggregation: logits = M @ XW2 + b2
    out = aggregate(M_p, xw2, b2_p, tm=tm, tk=tk, apply_relu=False,
                    out_dtype=jnp.float32, vmem_limit=vmem_limit)
    return out[:N, :nclass]


def reference_forward(x, edge_index, params):
    """Quantization-matched pure-JAX reference (bf16 operand storage, f32 math)."""
    (W1, b1), (W2, b2) = params
    N = x.shape[0]
    M = build_norm_adj(edge_index, N)

    def q(a):  # bf16 round-trip matches kernel operand/intermediate storage
        return a.astype(jnp.bfloat16).astype(jnp.float32)

    xw1 = q(jnp.dot(q(x), q(W1)))
    h = jnp.maximum(jnp.dot(q(M), xw1) + b1.reshape(1, -1), 0.0)
    xw2 = q(jnp.dot(q(h), q(W2)))
    return jnp.dot(q(M), xw2) + b2.reshape(1, -1)


def reference_forward_fp32(x, edge_index, params):
    (W1, b1), (W2, b2) = params
    M = build_norm_adj(edge_index, x.shape[0])
    h = jnp.maximum(M @ (x @ W1) + b1.reshape(1, -1), 0.0)
    return M @ (h @ W2) + b2.reshape(1, -1)


def glorot(key, fan_in, fan_out):
    limit = np.sqrt(6.0 / (fan_in + fan_out))
    return jax.random.uniform(key, (fan_in, fan_out), jnp.float32,
                              minval=-limit, maxval=limit)


# ------------------------- main -------------------------

if __name__ == "__main__":
    N, nfeat, nhid, nclass = 16, 8, 32, 4

    key = jax.random.PRNGKey(0)
    kx, k1, k2 = jax.random.split(key, 3)

    # Node features.
    x = jax.random.normal(kx, (N, nfeat), jnp.float32)

    # Deterministic undirected graph: ring + a few random chords.
    rng = np.random.RandomState(0)
    src = list(range(N)) + list(rng.randint(0, N, size=10))
    dst = [(i + 1) % N for i in range(N)] + list(rng.randint(0, N, size=10))
    pairs = set()
    for s, d in zip(src, dst):
        if s != d:
            pairs.add((s, d))
            pairs.add((d, s))
    edge_index = jnp.asarray(np.array(sorted(pairs)).T, dtype=jnp.int32)  # [2, E]

    # Parameters (glorot weights stored as [Fin, Fout], zero bias).
    params = [
        (glorot(k1, nfeat, nhid), jnp.zeros((1, nhid), jnp.float32)),
        (glorot(k2, nhid, nclass), jnp.zeros((1, nclass), jnp.float32)),
    ]

    # Fused single-kernel path (selected automatically for small graphs).
    out_fused = jax.block_until_ready(stand_gcn2_forward(x, edge_index, params, mode="auto"))
    assert out_fused.shape == (N, nclass)

    # Tiled multi-kernel path (the large-graph code path), forced for coverage.
    out_tiled = jax.block_until_ready(stand_gcn2_forward(x, edge_index, params, mode="tiled"))
    assert out_tiled.shape == (N, nclass)

    # Tight check vs the bf16-quantization-matched reference.
    ref_q = reference_forward(x, edge_index, params)
    np.testing.assert_allclose(np.asarray(out_fused), np.asarray(ref_q),
                               rtol=1e-3, atol=1e-3)
    np.testing.assert_allclose(np.asarray(out_tiled), np.asarray(ref_q),
                               rtol=1e-3, atol=1e-3)

    # Loose sanity check vs the full-f32 reference (bf16 storage error budget).
    ref_f = reference_forward_fp32(x, edge_index, params)
    np.testing.assert_allclose(np.asarray(out_fused), np.asarray(ref_f),
                               rtol=5e-2, atol=5e-2)

    print("KERNEL_OK")
</pallas_src>

<mosaic_0001>
module attributes {stable_mosaic.version = 11 : i64} {
  func.func @_fused_forward_kernel(%arg0: memref<128x128xbf16, #tpu.memory_space<vmem>>, %arg1: memref<128x128xbf16, #tpu.memory_space<vmem>>, %arg2: memref<128x128xbf16, #tpu.memory_space<vmem>>, %arg3: memref<1x128xf32, #tpu.memory_space<vmem>>, %arg4: memref<128x128xbf16, #tpu.memory_space<vmem>>, %arg5: memref<1x128xf32, #tpu.memory_space<vmem>>, %arg6: memref<128x128xf32, #tpu.memory_space<vmem>>) attributes {dimension_semantics = [], scalar_prefetch = 0 : i64, scratch_operands = 0 : i64, tpu.core_type = #tpu.core_type<tc>} {
    %c0 = arith.constant 0 : index
    %c0_0 = arith.constant 0 : index
    %0 = vector.load %arg1[%c0, %c0_0] : memref<128x128xbf16, #tpu.memory_space<vmem>>, vector<128x128xbf16>
    %c0_1 = arith.constant 0 : index
    %c0_2 = arith.constant 0 : index
    %1 = vector.load %arg2[%c0_1, %c0_2] : memref<128x128xbf16, #tpu.memory_space<vmem>>, vector<128x128xbf16>
    %cst = arith.constant dense<0.000000e+00> : vector<128x128xf32>
    %2 = tpu.matmul %0, %1, %cst {dimension_numbers = #tpu.dot_dimension_numbers<[1], [0], [0], [1], [0, 0, 1, 1], [], []>} : vector<128x128xbf16>, vector<128x128xbf16>, vector<128x128xf32> -> vector<128x128xf32>
    %3 = arith.truncf %2 : vector<128x128xf32> to vector<128x128xbf16>
    %c0_3 = arith.constant 0 : index
    %c0_4 = arith.constant 0 : index
    %4 = vector.load %arg0[%c0_3, %c0_4] : memref<128x128xbf16, #tpu.memory_space<vmem>>, vector<128x128xbf16>
    %cst_5 = arith.constant dense<0.000000e+00> : vector<128x128xf32>
    %5 = tpu.matmul %4, %3, %cst_5 {dimension_numbers = #tpu.dot_dimension_numbers<[1], [0], [0], [1], [0, 0, 1, 1], [], []>} : vector<128x128xbf16>, vector<128x128xbf16>, vector<128x128xf32> -> vector<128x128xf32>
    %c0_6 = arith.constant 0 : index
    %c0_7 = arith.constant 0 : index
    %6 = vector.load %arg3[%c0_6, %c0_7] : memref<1x128xf32, #tpu.memory_space<vmem>>, vector<1x128xf32>
    %7 = vector.broadcast %6 : vector<1x128xf32> to vector<128x128xf32>
    %8 = arith.addf %5, %7 : vector<128x128xf32>
    %cst_8 = arith.constant 0.000000e+00 : f32
    %9 = vector.broadcast %cst_8 : f32 to vector<128x128xf32>
    %10 = arith.maximumf %8, %9 : vector<128x128xf32>
    %11 = arith.truncf %10 : vector<128x128xf32> to vector<128x128xbf16>
    %c0_9 = arith.constant 0 : index
    %c0_10 = arith.constant 0 : index
    %12 = vector.load %arg4[%c0_9, %c0_10] : memref<128x128xbf16, #tpu.memory_space<vmem>>, vector<128x128xbf16>
    %cst_11 = arith.constant dense<0.000000e+00> : vector<128x128xf32>
    %13 = tpu.matmul %11, %12, %cst_11 {dimension_numbers = #tpu.dot_dimension_numbers<[1], [0], [0], [1], [0, 0, 1, 1], [], []>} : vector<128x128xbf16>, vector<128x128xbf16>, vector<128x128xf32> -> vector<128x128xf32>
    %14 = arith.truncf %13 : vector<128x128xf32> to vector<128x128xbf16>
    %c0_12 = arith.constant 0 : index
    %c0_13 = arith.constant 0 : index
    %15 = vector.load %arg0[%c0_12, %c0_13] : memref<128x128xbf16, #tpu.memory_space<vmem>>, vector<128x128xbf16>
    %cst_14 = arith.constant dense<0.000000e+00> : vector<128x128xf32>
    %16 = tpu.matmul %15, %14, %cst_14 {dimension_numbers = #tpu.dot_dimension_numbers<[1], [0], [0], [1], [0, 0, 1, 1], [], []>} : vector<128x128xbf16>, vector<128x128xbf16>, vector<128x128xf32> -> vector<128x128xf32>
    %c0_15 = arith.constant 0 : index
    %c0_16 = arith.constant 0 : index
    %17 = vector.load %arg5[%c0_15, %c0_16] : memref<1x128xf32, #tpu.memory_space<vmem>>, vector<1x128xf32>
    %18 = vector.broadcast %17 : vector<1x128xf32> to vector<128x128xf32>
    %19 = arith.addf %16, %18 : vector<128x128xf32>
    %c0_17 = arith.constant 0 : index
    %c0_18 = arith.constant 0 : index
    %20 = vector.load %arg6[%c0_17, %c0_18] : memref<128x128xf32, #tpu.memory_space<vmem>>, vector<128x128xf32>
    tpu.vector_store %arg6[%c0_17, %c0_18], %19 {strides = array<i32>} : memref<128x128xf32, #tpu.memory_space<vmem>>, vector<128x128xf32>,
    return
  }
}

</mosaic_0001>

<bundles_post_ra>
// kernel: tpu_custom_call.1
= control target key start
LH: loop header
LB: loop body
LE: loop exit
PB: predicated region body
PF: predicated region fallthrough
CT: control target
= control target key end

     0   :  { %11 = vsyncpa [#allocation3], 0  ;;  %s1366_s0 = inlined_call_operand.hbm [shape: bf16[128,128], index: 0, kind: input, shape index: {}]   ;;  %s1367_s1 = inlined_call_operand.hbm [shape: bf16[128,128], index: 1, kind: input, shape index: {}]   ;;  %s1368_s2 = inlined_call_operand.hbm [shape: bf16[128,128], index: 2, kind: input, shape index: {}]   ;;  %s1369_s3 = inlined_call_operand.vmem [shape: f32[1,128], index: 3, kind: input, shape index: {}]   ;;  %s1370_s4 = inlined_call_operand.hbm [shape: bf16[128,128], index: 4, kind: input, shape index: {}]   ;;  %s1371_s5 = inlined_call_operand.vmem [shape: f32[1,128], index: 5, kind: input, shape index: {}]   ;;  %s1372_s6 = inlined_call_operand.hbm [shape: f32[128,128], index: 6, kind: output, shape index: {}]  }
   0x1   :  { %12 = vsyncpa [#allocation6], 0 }
   0x2   :  { %13 = vsyncpa [#allocation9], 0 }
   0x3   :  { %14 = vsyncpa [#allocation4], 0  ;;  %s1198_s21 = smov [#allocation5]   ;;  %s1199_s23 = smov [#allocation2]  }
   0x4   :  { %s32_s22 = sshll.u32 %s1198_s21, 4  ;;  %s20_s24 = sshll.u32 %s1199_s23, 4  ;;  %s33_s22 = int_to_ptr.vmem [resolvable:$true] %s32_s22  ;;  %s1242_s24 = int_to_ptr.vmem [resolvable:$true] %s20_s24 }
   0x5   :  { %s1080_s27 = scalar_lea.hbm %s1367_s1, 1024 }
   0x6   :  { %p1081_p0 = scmp.ne.s32.totalorder %s1367_s1, %s1080_s27  ;;  %p1084_p1 = scmp.lt.u32.totalorder %s1080_s27, %s1367_s1 }
   0x8   :  { %p1086_p2 = pnand %p1084_p1, %p1081_p0 }
   0xa   :  { %1089 = shalt.err (!%p1086_p2)
}
   0xb   :  { %s1090_s8 = scalar_lea.vmem %s33_s22, 1024  ;;  %p1095_p4 = scmp.lt.s32.totalorder %s33_s22, %s33_s22 }
   0xc   :  { %p1091_p3 = scmp.ne.s32.totalorder %s33_s22, %s1090_s8  ;;  %p1096_p5 = scmp.lt.s32.totalorder %s1090_s8, %s1090_s8 }
   0xe   :  { %p1097_p6 = por %p1096_p5, %p1095_p4 }
  0x10   :  { %p1098_p7 = pnand %p1097_p6, %p1091_p3 }
  0x12   :  { %1101 = shalt.err (!%p1098_p7)
}
  0x13   :  { %s1200_s9 = smov 64   ;;  %s1201_s10 = smov 4  }
  0x14   :  { %38 = dma.hbm_to_vmem [thread:$0]  %s1367_s1, 1024, %s33_s22, [#allocation6], %s1200_s9, %s1200_s9, %s1201_s10  }
  0x15   :  { %s1102_s15 = scalar_lea.hbm %s1366_s0, 1024 }
  0x16   :  { %p1103_p8 = scmp.ne.s32.totalorder %s1366_s0, %s1102_s15  ;;  %p1106_p9 = scmp.lt.u32.totalorder %s1102_s15, %s1366_s0 }
  0x18   :  { %p1108_p10 = pnand %p1106_p9, %p1103_p8 }
  0x1a   :  { %1111 = shalt.err (!%p1108_p10)
}
  0x1b   :  { %s1112_s20 = scalar_lea.vmem %s1242_s24, 1024  ;;  %p1117_p12 = scmp.lt.s32.totalorder %s1242_s24, %s1242_s24 }
  0x1c   :  { %p1113_p11 = scmp.ne.s32.totalorder %s1242_s24, %s1112_s20  ;;  %p1118_p13 = scmp.lt.s32.totalorder %s1112_s20, %s1112_s20 }
  0x1e   :  { %p1119_p0 = por %p1118_p13, %p1117_p12 }
  0x20   :  { %p1120_p1 = pnand %p1119_p0, %p1113_p11 }
  0x22   :  { %1123 = shalt.err (!%p1120_p1)
}
  0x23   :  { %26 = dma.hbm_to_vmem [thread:$0]  %s1366_s0, 1024, %s1242_s24, [#allocation3], %s1200_s9, %s1200_s9, %s1201_s10  }
  0x24   :  { %s1202_s22 = smov [#allocation7]   ;;  %s1203_s25 = smov [#allocation8]  }
  0x25   :  { %s44_s23 = sshll.u32 %s1202_s22, 4  ;;  %s58_s26 = sshll.u32 %s1203_s25, 4  ;;  %s45_s23 = int_to_ptr.vmem [resolvable:$true] %s44_s23  ;;  %s1279_s26 = int_to_ptr.vmem [resolvable:$true] %s58_s26 }
  0x26   :  { %s1124_s29 = scalar_lea.hbm %s1368_s2, 1024 }
  0x27   :  { %p1125_p2 = scmp.ne.s32.totalorder %s1368_s2, %s1124_s29  ;;  %p1128_p3 = scmp.lt.u32.totalorder %s1124_s29, %s1368_s2 }
  0x29   :  { %p1130_p4 = pnand %p1128_p3, %p1125_p2 }
  0x2b   :  { %1133 = shalt.err (!%p1130_p4)
}
  0x2c   :  { %s1134_s0 = scalar_lea.vmem %s45_s23, 1024  ;;  %p1139_p6 = scmp.lt.s32.totalorder %s45_s23, %s45_s23 }
  0x2d   :  { %p1135_p5 = scmp.ne.s32.totalorder %s45_s23, %s1134_s0  ;;  %p1140_p7 = scmp.lt.s32.totalorder %s1134_s0, %s1134_s0 }
  0x2f   :  { %p1141_p8 = por %p1140_p7, %p1139_p6 }
  0x31   :  { %p1142_p9 = pnand %p1141_p8, %p1135_p5 }
  0x33   :  { %1145 = shalt.err (!%p1142_p9)
}
  0x34   :  { %50 = dma.hbm_to_vmem [thread:$0]  %s1368_s2, 1024, %s45_s23, [#allocation6], %s1200_s9, %s1200_s9, %s1201_s10  }
  0x35   :  { %s1146_s15 = scalar_lea.hbm %s1370_s4, 1024 }
  0x36   :  { %p1147_p10 = scmp.ne.s32.totalorder %s1370_s4, %s1146_s15  ;;  %p1150_p11 = scmp.lt.u32.totalorder %s1146_s15, %s1370_s4 }
  0x38   :  { %p1152_p12 = pnand %p1150_p11, %p1147_p10 }
  0x3a   :  { %1155 = shalt.err (!%p1152_p12)
}
  0x3b   :  { %s1156_s20 = scalar_lea.vmem %s1279_s26, 1024  ;;  %p1161_p0 = scmp.lt.s32.totalorder %s1279_s26, %s1279_s26 }
  0x3c   :  { %p1157_p13 = scmp.ne.s32.totalorder %s1279_s26, %s1156_s20  ;;  %p1162_p1 = scmp.lt.s32.totalorder %s1156_s20, %s1156_s20 }
  0x3e   :  { %p1163_p2 = por %p1162_p1, %p1161_p0 }
  0x40   :  { %p1164_p3 = pnand %p1163_p2, %p1157_p13 }
  0x42   :  { %1167 = shalt.err (!%p1164_p3)
}
  0x43   :  { %64 = dma.hbm_to_vmem [thread:$0]  %s1370_s4, 1024, %s1279_s26, [#allocation9], %s1200_s9, %s1200_s9, %s1201_s10  }
  0x44   :  { %1190 = dma.done.wait [#allocation3], 1024  }
  0x45   :  { %1191 = vsyncadd [#allocation3], 4294966272 }
  0x46   :  { %1192 = dma.done.wait [#allocation6], 2048  }
  0x47   :  { %1193 = vsyncadd [#allocation6], 4294965248 }
  0x48   :  { %1194 = dma.done.wait [#allocation9], 1024  }
  0x49   :  { %1195 = vsyncadd [#allocation9], 4294966272  ;;  %v1048_v0 = vld [vmem:[#allocation7] sm:$0xff]   ;;  %v1049_v1 = vld [vmem:[#allocation7 + $0x8] sm:$0xff]  }
  0x4a   :  { %911 = vmatprep.subr.bf16.mxu0 %v1048_v0  ;;  %v1050_v2 = vld [vmem:[#allocation7 + $0x10] sm:$0xff]   ;;  %v1051_v3 = vld [vmem:[#allocation7 + $0x18] sm:$0xff]   ;;  %v1056_v4 = vld [vmem:[#allocation5] sm:$0xff]  }
  0x4b   :  { %912 = vmatpush3.bf16.msra.mxu0 %v1048_v0  ;;  %927 = vmatprep.mubr.bf16.mxu0 %v1056_v4  ;;  %v1052_v5 = vld [vmem:[#allocation7 + $0x20] sm:$0xff]   ;;  %v1053_v6 = vld [vmem:[#allocation7 + $0x28] sm:$0xff]   ;;  %v1054_v7 = vld [vmem:[#allocation7 + $0x30] sm:$0xff]  }
  0x4c   :  { %913 = vmatprep.subr.bf16.mxu0 %v1049_v1  ;;  %v1055_v8 = vld [vmem:[#allocation7 + $0x38] sm:$0xff]   ;;  %v1057_v9 = vld [vmem:[#allocation5 + $0x8] sm:$0xff]   ;;  %v1058_v10 = vld [vmem:[#allocation5 + $0x10] sm:$0xff]  }
  0x4d   :  { %v1059_v11 = vld [vmem:[#allocation5 + $0x18] sm:$0xff]   ;;  %v1060_v12 = vld [vmem:[#allocation5 + $0x20] sm:$0xff]   ;;  %v1061_v13 = vld [vmem:[#allocation5 + $0x28] sm:$0xff]  }
  0x4e   :  { %v1062_v14 = vld [vmem:[#allocation5 + $0x30] sm:$0xff]   ;;  %v1063_v15 = vld [vmem:[#allocation5 + $0x38] sm:$0xff]   ;;  %v1316_v16 = vld [vmem:[#allocation2] sm:$0xff]  }
  0x4f   :  { %914 = vmatpush3.bf16.msra.mxu0 %v1049_v1  ;;  %959 = vmatprep.mubr.bf16.mxu1 %v1316_v16  ;;  %v1072_v17 = vld [vmem:[#allocation8] sm:$0xff]   ;;  %v1073_v18 = vld [vmem:[#allocation8 + $0x8] sm:$0xff]   ;;  %v1074_v19 = vld [vmem:[#allocation8 + $0x10] sm:$0xff]  }
  0x50   :  { %915 = vmatprep.subr.bf16.mxu0 %v1050_v2  ;;  %v1075_v20 = vld [vmem:[#allocation8 + $0x18] sm:$0xff]   ;;  %v1076_v21 = vld [vmem:[#allocation8 + $0x20] sm:$0xff]   ;;  %v1077_v22 = vld [vmem:[#allocation8 + $0x28] sm:$0xff]  }
  0x51   :  { %v1319_v47 = vld [vmem:[#allocation2 + $0x8] sm:$0xff]   ;;  %v1321_v48 = vld [vmem:[#allocation2 + $0x10] sm:$0xff]   ;;  %v1325_v49 = vld [vmem:[#allocation2 + $0x18] sm:$0xff]  }
  0x52   :  { %v1327_v50 = vld [vmem:[#allocation2 + $0x20] sm:$0xff]   ;;  %v1331_v51 = vld [vmem:[#allocation2 + $0x28] sm:$0xff]   ;;  %v1333_v52 = vld [vmem:[#allocation2 + $0x30] sm:$0xff]  }
  0x53   :  { %916 = vmatpush3.bf16.msra.mxu0 %v1050_v2  ;;  %v1337_v53 = vld [vmem:[#allocation2 + $0x38] sm:$0xff]   ;;  %v1078_v54 = vld [vmem:[#allocation8 + $0x30] sm:$0xff]   ;;  %v829_v56 = vld [vmem:[%s1369_s3] ss:$0 sm:$0xff] }
  0x54   :  { %917 = vmatprep.subr.bf16.mxu0 %v1051_v3  ;;  %v1079_v55 = vld [vmem:[#allocation8 + $0x38] sm:$0xff]  }
  0x57   :  { %918 = vmatpush3.bf16.msra.mxu0 %v1051_v3 }
  0x58   :  { %919 = vmatprep.subr.bf16.mxu0 %v1052_v5 }
  0x5b   :  { %920 = vmatpush3.bf16.msra.mxu0 %v1052_v5 }
  0x5c   :  { %921 = vmatprep.subr.bf16.mxu0 %v1053_v6 }
  0x5f   :  { %922 = vmatpush3.bf16.msra.mxu0 %v1053_v6 }
  0x60   :  { %923 = vmatprep.subr.bf16.mxu0 %v1054_v7 }
  0x63   :  { %924 = vmatpush3.bf16.msra.mxu0 %v1054_v7 }
  0x64   :  { %925 = vmatprep.subr.bf16.mxu0 %v1055_v8 }
  0x67   :  { %926 = vmatpush3.bf16.msra.mxu0 %v1055_v8 }
  0x68   :  { %975 = vmatprep.subr.bf16.mxu0 %v1072_v17 }
  0x6a   :  { %928 = vmatmul.mubr.bf16.vlgmr.msra.gmra.mrb[0].mxu0 %v1057_v9 }
  0x6b   :  { %931 = vmatprep.mubr.bf16.mxu0 %v1058_v10  ;;  %976 = vmatpush3.bf16.msra.mxu0 %v1072_v17 }
  0x6c   :  { %977 = vmatprep.subr.bf16.mxu0 %v1073_v18 }
  0x6f   :  { %978 = vmatpush3.bf16.msra.mxu0 %v1073_v18 }
  0x70   :  { %979 = vmatprep.subr.bf16.mxu0 %v1074_v19 }
  0x72   :  { %932 = vmatmul.mubr.bf16.gmra.mrb[4].mxu0 %v1059_v11 }
  0x73   :  { %935 = vmatprep.mubr.bf16.mxu0 %v1060_v12  ;;  %980 = vmatpush3.bf16.msra.mxu0 %v1074_v19 }
  0x74   :  { %981 = vmatprep.subr.bf16.mxu0 %v1075_v20 }
  0x77   :  { %982 = vmatpush3.bf16.msra.mxu0 %v1075_v20 }
  0x78   :  { %983 = vmatprep.subr.bf16.mxu0 %v1076_v21 }
  0x7a   :  { %936 = vmatmul.mubr.bf16.gmra.mrb[8].mxu0 %v1061_v13 }
  0x7b   :  { %939 = vmatprep.mubr.bf16.mxu0 %v1062_v14  ;;  %984 = vmatpush3.bf16.msra.mxu0 %v1076_v21 }
  0x7c   :  { %985 = vmatprep.subr.bf16.mxu0 %v1077_v22 }
  0x7f   :  { %986 = vmatpush3.bf16.msra.mxu0 %v1077_v22 }
  0x80   :  { %987 = vmatprep.subr.bf16.mxu0 %v1078_v54 }
  0x82   :  { %940 = vmatmul.mubr.bf16.gmra.mrb[12].mxu0 %v1063_v15 }
  0x83   :  { %988 = vmatpush3.bf16.msra.mxu0 %v1078_v54 }
  0x84   :  { %989 = vmatprep.subr.bf16.mxu0 %v1079_v55 }
  0x87   :  { %990 = vmatpush3.bf16.msra.mxu0 %v1079_v55 }
 0x13d   :  { %v929_v23 = vpop.f32.mrb[0].mxu0 }
 0x13e   :  { %v242_v24 = vpop.f32.mrb[1].mxu0 }
 0x13f   :  { %v930_v25 = vpop.f32.mrb[2].mxu0 }
 0x140   :  { %v306_v26 = vpack.c.bf16 %v930_v25, %v929_v23  ;;  %v245_v27 = vpop.f32.mrb[3].mxu0 }
 0x141   :  { %v305_v28 = vpack.c.bf16 %v245_v27, %v242_v24 }
 0x143   :  { %943 = vmatprep.subr.bf16.mxu1 %v305_v28 }
 0x144   :  { %944 = vmatpush3.bf16.msra.mxu1 %v305_v28 }
 0x145   :  { %v933_v29 = vpop.f32.mrb[4].mxu0  ;;  %945 = vmatprep.subr.bf16.mxu1 %v306_v26 }
 0x146   :  { %v258_v30 = vpop.f32.mrb[5].mxu0 }
 0x147   :  { %v934_v31 = vpop.f32.mrb[6].mxu0 }
 0x148   :  { %v308_v32 = vpack.c.bf16 %v934_v31, %v933_v29  ;;  %v261_v33 = vpop.f32.mrb[7].mxu0  ;;  %946 = vmatpush3.bf16.msra.mxu1 %v306_v26 }
 0x149   :  { %v307_v34 = vpack.c.bf16 %v261_v33, %v258_v30 }
 0x14b   :  { %947 = vmatprep.subr.bf16.mxu1 %v307_v34 }
 0x14c   :  { %948 = vmatpush3.bf16.msra.mxu1 %v307_v34 }
 0x14d   :  { %v937_v35 = vpop.f32.mrb[8].mxu0  ;;  %949 = vmatprep.subr.bf16.mxu1 %v308_v32 }
 0x14e   :  { %v274_v36 = vpop.f32.mrb[9].mxu0 }
 0x14f   :  { %v938_v37 = vpop.f32.mrb[10].mxu0 }
 0x150   :  { %v310_v38 = vpack.c.bf16 %v938_v37, %v937_v35  ;;  %v277_v39 = vpop.f32.mrb[11].mxu0  ;;  %950 = vmatpush3.bf16.msra.mxu1 %v308_v32 }
 0x151   :  { %v309_v40 = vpack.c.bf16 %v277_v39, %v274_v36 }
 0x153   :  { %951 = vmatprep.subr.bf16.mxu1 %v309_v40 }
 0x154   :  { %952 = vmatpush3.bf16.msra.mxu1 %v309_v40 }
 0x155   :  { %v941_v41 = vpop.f32.mrb[12].mxu0  ;;  %953 = vmatprep.subr.bf16.mxu1 %v310_v38 }
 0x156   :  { %v290_v42 = vpop.f32.mrb[13].mxu0 }
 0x157   :  { %v942_v43 = vpop.f32.mrb[14].mxu0 }
 0x158   :  { %v312_v44 = vpack.c.bf16 %v942_v43, %v941_v41  ;;  %v293_v45 = vpop.f32.mrb[15].mxu0  ;;  %954 = vmatpush3.bf16.msra.mxu1 %v310_v38 }
 0x159   :  { %v311_v46 = vpack.c.bf16 %v293_v45, %v290_v42 }
 0x15b   :  { %955 = vmatprep.subr.bf16.mxu1 %v311_v46 }
 0x15c   :  { %956 = vmatpush3.bf16.msra.mxu1 %v311_v46 }
 0x15d   :  { %957 = vmatprep.subr.bf16.mxu1 %v312_v44 }
 0x160   :  { %958 = vmatpush3.bf16.msra.mxu1 %v312_v44 }
 0x163   :  { %960 = vmatmul.mubr.bf16.vlgmr.msra.gmra.mrb[0].mxu1 %v1319_v47 }
 0x164   :  { %963 = vmatprep.mubr.bf16.mxu1 %v1321_v48 }
 0x16b   :  { %964 = vmatmul.mubr.bf16.gmra.mrb[4].mxu1 %v1325_v49 }
 0x16c   :  { %967 = vmatprep.mubr.bf16.mxu1 %v1327_v50 }
 0x173   :  { %968 = vmatmul.mubr.bf16.gmra.mrb[8].mxu1 %v1331_v51 }
 0x174   :  { %971 = vmatprep.mubr.bf16.mxu1 %v1333_v52 }
 0x17b   :  { %972 = vmatmul.mubr.bf16.gmra.mrb[12].mxu1 %v1337_v53 }
 0x17c   :  { %1023 = vmatprep.mubr.bf16.mxu1 %v1316_v16 }
 0x236   :  { %v961_v57 = vpop.f32.mrb[0].mxu1 }
 0x237   :  { %v427_v58 = vadd.f32 %v961_v57, %v829_v56  ;;  %v418_v59 = vpop.f32.mrb[1].mxu1 }
 0x238   :  { %v419_v60 = vadd.f32 %v829_v56, %v418_v59  ;;  %v962_v61 = vpop.f32.mrb[2].mxu1 }
 0x239   :  { %v430_v62 = vadd.f32 %v962_v61, %v829_v56  ;;  %v421_v63 = vpop.f32.mrb[3].mxu1  ;;  %v483_v1 = vmax.f32 %v427_v58, 0.0 }
 0x23a   :  { %v422_v0 = vadd.f32 %v829_v56, %v421_v63  ;;  %v481_v3 = vmax.f32 %v419_v60, 0.0 }
 0x23b   :  { %v484_v2 = vmax.f32 %v430_v62, 0.0 }
 0x23c   :  { %v482_v4 = vmax.f32 %v422_v0, 0.0 }
 0x23d   :  { %v498_v5 = vpack.c.bf16 %v484_v2, %v483_v1 }
 0x23e   :  { %v497_v6 = vpack.c.bf16 %v482_v4, %v481_v3  ;;  %v965_v7 = vpop.f32.mrb[4].mxu1 }
 0x23f   :  { %v443_v8 = vadd.f32 %v965_v7, %v829_v56  ;;  %v434_v9 = vpop.f32.mrb[5].mxu1 }
 0x240   :  { %v435_v10 = vadd.f32 %v829_v56, %v434_v9  ;;  %v966_v11 = vpop.f32.mrb[6].mxu1  ;;  %991 = vmatprep.mubr.bf16.mxu0 %v497_v6 }
 0x241   :  { %v446_v12 = vadd.f32 %v966_v11, %v829_v56  ;;  %v437_v13 = vpop.f32.mrb[7].mxu1  ;;  %992 = vmatmul.mubr.bf16.vlgmr.msra.gmra.mrb[16].mxu0 %v498_v5  ;;  %v487_v15 = vmax.f32 %v443_v8, 0.0 }
 0x242   :  { %v438_v14 = vadd.f32 %v829_v56, %v437_v13  ;;  %v485_v17 = vmax.f32 %v435_v10, 0.0 }
 0x243   :  { %v488_v16 = vmax.f32 %v446_v12, 0.0 }
 0x244   :  { %v486_v18 = vmax.f32 %v438_v14, 0.0 }
 0x245   :  { %v500_v19 = vpack.c.bf16 %v488_v16, %v487_v15  ;;  %v846_v16 = vld [vmem:[%s1371_s5] ss:$0 sm:$0xff]  ;;  %s1204_s5 = smov [#allocation10]  }
 0x246   :  { %v499_v20 = vpack.c.bf16 %v486_v18, %v485_v17  ;;  %v969_v21 = vpop.f32.mrb[8].mxu1  ;;  %s799_s21 = sshll.u32 %s1204_s5, 4  ;;  %s800_s21 = int_to_ptr.vmem [resolvable:$true] %s799_s21 }
 0x247   :  { %v459_v22 = vadd.f32 %v969_v21, %v829_v56  ;;  %v450_v23 = vpop.f32.mrb[9].mxu1  ;;  %s1168_s22 = scalar_lea.vmem %s800_s21, 2048  ;;  %p1173_p5 = scmp.lt.s32.totalorder %s800_s21, %s800_s21 }
 0x248   :  { %v451_v24 = vadd.f32 %v829_v56, %v450_v23  ;;  %v970_v25 = vpop.f32.mrb[10].mxu1  ;;  %995 = vmatprep.mubr.bf16.mxu0 %v499_v20  ;;  %p1169_p4 = scmp.ne.s32.totalorder %s800_s21, %s1168_s22  ;;  %p1174_p6 = scmp.lt.s32.totalorder %s1168_s22, %s1168_s22 }
 0x249   :  { %v462_v26 = vadd.f32 %v970_v25, %v829_v56  ;;  %v453_v27 = vpop.f32.mrb[11].mxu1  ;;  %996 = vmatmul.mubr.bf16.gmra.mrb[20].mxu0 %v500_v19  ;;  %v491_v29 = vmax.f32 %v459_v22, 0.0 }
 0x24a   :  { %v454_v28 = vadd.f32 %v829_v56, %v453_v27  ;;  %v489_v31 = vmax.f32 %v451_v24, 0.0  ;;  %p1175_p7 = por %p1174_p6, %p1173_p5 }
 0x24b   :  { %v492_v30 = vmax.f32 %v462_v26, 0.0 }
 0x24c   :  { %v490_v32 = vmax.f32 %v454_v28, 0.0  ;;  %p1176_p8 = pnand %p1175_p7, %p1169_p4 }
 0x24d   :  { %v502_v33 = vpack.c.bf16 %v492_v30, %v491_v29 }
 0x24e   :  { %v501_v34 = vpack.c.bf16 %v490_v32, %v489_v31  ;;  %v973_v35 = vpop.f32.mrb[12].mxu1 }
 0x24f   :  { %v475_v36 = vadd.f32 %v973_v35, %v829_v56  ;;  %v466_v37 = vpop.f32.mrb[13].mxu1 }
 0x250   :  { %v467_v38 = vadd.f32 %v829_v56, %v466_v37  ;;  %v974_v39 = vpop.f32.mrb[14].mxu1  ;;  %999 = vmatprep.mubr.bf16.mxu0 %v501_v34 }
 0x251   :  { %v478_v40 = vadd.f32 %v974_v39, %v829_v56  ;;  %v469_v41 = vpop.f32.mrb[15].mxu1  ;;  %1000 = vmatmul.mubr.bf16.gmra.mrb[24].mxu0 %v502_v33  ;;  %v495_v43 = vmax.f32 %v475_v36, 0.0 }
 0x252   :  { %v470_v42 = vadd.f32 %v829_v56, %v469_v41  ;;  %v493_v45 = vmax.f32 %v467_v38, 0.0 }
 0x253   :  { %v496_v44 = vmax.f32 %v478_v40, 0.0 }
 0x254   :  { %v494_v46 = vmax.f32 %v470_v42, 0.0 }
 0x255   :  { %v504_v54 = vpack.c.bf16 %v496_v44, %v495_v43 }
 0x256   :  { %v503_v55 = vpack.c.bf16 %v494_v46, %v493_v45 }
 0x258   :  { %1003 = vmatprep.mubr.bf16.mxu0 %v503_v55 }
 0x259   :  { %1004 = vmatmul.mubr.bf16.gmra.mrb[28].mxu0 %v504_v54 }
 0x314   :  { %v993_v57 = vpop.f32.mrb[16].mxu0 }
 0x315   :  { %v603_v58 = vpop.f32.mrb[17].mxu0 }
 0x316   :  { %v994_v59 = vpop.f32.mrb[18].mxu0 }
 0x317   :  { %v667_v60 = vpack.c.bf16 %v994_v59, %v993_v57  ;;  %v606_v61 = vpop.f32.mrb[19].mxu0 }
 0x318   :  { %v666_v62 = vpack.c.bf16 %v606_v61, %v603_v58 }
 0x31a   :  { %1007 = vmatprep.subr.bf16.mxu1 %v666_v62 }
 0x31b   :  { %1008 = vmatpush3.bf16.msra.mxu1 %v666_v62 }
 0x31c   :  { %v997_v63 = vpop.f32.mrb[20].mxu0  ;;  %1009 = vmatprep.subr.bf16.mxu1 %v667_v60 }
 0x31d   :  { %v619_v0 = vpop.f32.mrb[21].mxu0 }
 0x31e   :  { %v998_v56 = vpop.f32.mrb[22].mxu0 }
 0x31f   :  { %v669_v1 = vpack.c.bf16 %v998_v56, %v997_v63  ;;  %v622_v2 = vpop.f32.mrb[23].mxu0  ;;  %1010 = vmatpush3.bf16.msra.mxu1 %v667_v60 }
 0x320   :  { %v668_v3 = vpack.c.bf16 %v622_v2, %v619_v0 }
 0x322   :  { %1011 = vmatprep.subr.bf16.mxu1 %v668_v3 }
 0x323   :  { %1012 = vmatpush3.bf16.msra.mxu1 %v668_v3 }
 0x324   :  { %v1001_v4 = vpop.f32.mrb[24].mxu0  ;;  %1013 = vmatprep.subr.bf16.mxu1 %v669_v1 }
 0x325   :  { %v635_v5 = vpop.f32.mrb[25].mxu0 }
 0x326   :  { %v1002_v6 = vpop.f32.mrb[26].mxu0 }
 0x327   :  { %v671_v7 = vpack.c.bf16 %v1002_v6, %v1001_v4  ;;  %v638_v8 = vpop.f32.mrb[27].mxu0  ;;  %1014 = vmatpush3.bf16.msra.mxu1 %v669_v1 }
 0x328   :  { %v670_v9 = vpack.c.bf16 %v638_v8, %v635_v5 }
 0x32a   :  { %1015 = vmatprep.subr.bf16.mxu1 %v670_v9 }
 0x32b   :  { %1016 = vmatpush3.bf16.msra.mxu1 %v670_v9 }
 0x32c   :  { %v1005_v10 = vpop.f32.mrb[28].mxu0  ;;  %1017 = vmatprep.subr.bf16.mxu1 %v671_v7 }
 0x32d   :  { %v651_v11 = vpop.f32.mrb[29].mxu0 }
 0x32e   :  { %v1006_v12 = vpop.f32.mrb[30].mxu0 }
 0x32f   :  { %v673_v13 = vpack.c.bf16 %v1006_v12, %v1005_v10  ;;  %v654_v14 = vpop.f32.mrb[31].mxu0  ;;  %1018 = vmatpush3.bf16.msra.mxu1 %v671_v7 }
 0x330   :  { %v672_v15 = vpack.c.bf16 %v654_v14, %v651_v11 }
 0x332   :  { %1019 = vmatprep.subr.bf16.mxu1 %v672_v15 }
 0x333   :  { %1020 = vmatpush3.bf16.msra.mxu1 %v672_v15 }
 0x334   :  { %1021 = vmatprep.subr.bf16.mxu1 %v673_v13 }
 0x337   :  { %1022 = vmatpush3.bf16.msra.mxu1 %v673_v13 }
 0x33a   :  { %1024 = vmatmul.mubr.bf16.vlgmr.msra.gmra.mrb[16].mxu1 %v1319_v47 }
 0x33b   :  { %1027 = vmatprep.mubr.bf16.mxu1 %v1321_v48 }
 0x342   :  { %1028 = vmatmul.mubr.bf16.gmra.mrb[20].mxu1 %v1325_v49 }
 0x343   :  { %1031 = vmatprep.mubr.bf16.mxu1 %v1327_v50 }
 0x34a   :  { %1032 = vmatmul.mubr.bf16.gmra.mrb[24].mxu1 %v1331_v51 }
 0x34b   :  { %1035 = vmatprep.mubr.bf16.mxu1 %v1333_v52 }
 0x352   :  { %1036 = vmatmul.mubr.bf16.gmra.mrb[28].mxu1 %v1337_v53 }
 0x40d   :  { %v1025_v17 = vpop.f32.mrb[16].mxu1 }
 0x40e   :  { %v724_v18 = vadd.f32 %v1025_v17, %v846_v16  ;;  %v715_v19 = vpop.f32.mrb[17].mxu1 }
 0x40f   :  { %v716_v47 = vadd.f32 %v846_v16, %v715_v19  ;;  %v1026_v20 = vpop.f32.mrb[18].mxu1 }
 0x410   :  { %780 = vst [vmem:[#allocation10 + $0x10] sm:$0xff] %v724_v18  ;;  %v727_v48 = vadd.f32 %v1026_v20, %v846_v16  ;;  %v718_v49 = vpop.f32.mrb[19].mxu1 }
 0x411   :  { %778 = vst [vmem:[#allocation10] sm:$0xff] %v716_v47  ;;  %v719_v50 = vadd.f32 %v846_v16, %v718_v49 }
 0x412   :  { %781 = vst [vmem:[#allocation10 + $0x18] sm:$0xff] %v727_v48 }
 0x413   :  { %779 = vst [vmem:[#allocation10 + $0x8] sm:$0xff] %v719_v50 }
 0x415   :  { %v1029_v51 = vpop.f32.mrb[20].mxu1 }
 0x416   :  { %v740_v52 = vadd.f32 %v1029_v51, %v846_v16  ;;  %v731_v21 = vpop.f32.mrb[21].mxu1 }
 0x417   :  { %v732_v53 = vadd.f32 %v846_v16, %v731_v21  ;;  %v1030_v22 = vpop.f32.mrb[22].mxu1 }
 0x418   :  { %784 = vst [vmem:[#allocation10 + $0x30] sm:$0xff] %v740_v52  ;;  %v743_v23 = vadd.f32 %v1030_v22, %v846_v16  ;;  %v734_v24 = vpop.f32.mrb[23].mxu1 }
 0x419   :  { %782 = vst [vmem:[#allocation10 + $0x20] sm:$0xff] %v732_v53  ;;  %v735_v25 = vadd.f32 %v846_v16, %v734_v24 }
 0x41a   :  { %785 = vst [vmem:[#allocation10 + $0x38] sm:$0xff] %v743_v23 }
 0x41b   :  { %783 = vst [vmem:[#allocation10 + $0x28] sm:$0xff] %v735_v25 }
 0x41d   :  { %v1033_v26 = vpop.f32.mrb[24].mxu1 }
 0x41e   :  { %v756_v27 = vadd.f32 %v1033_v26, %v846_v16  ;;  %v747_v28 = vpop.f32.mrb[25].mxu1 }
 0x41f   :  { %v748_v29 = vadd.f32 %v846_v16, %v747_v28  ;;  %v1034_v30 = vpop.f32.mrb[26].mxu1 }
 0x420   :  { %788 = vst [vmem:[#allocation10 + $0x50] sm:$0xff] %v756_v27  ;;  %v759_v31 = vadd.f32 %v1034_v30, %v846_v16  ;;  %v750_v32 = vpop.f32.mrb[27].mxu1 }
 0x421   :  { %786 = vst [vmem:[#allocation10 + $0x40] sm:$0xff] %v748_v29  ;;  %v751_v33 = vadd.f32 %v846_v16, %v750_v32 }
 0x422   :  { %789 = vst [vmem:[#allocation10 + $0x58] sm:$0xff] %v759_v31 }
 0x423   :  { %787 = vst [vmem:[#allocation10 + $0x48] sm:$0xff] %v751_v33 }
 0x425   :  { %v1037_v34 = vpop.f32.mrb[28].mxu1 }
 0x426   :  { %v772_v35 = vadd.f32 %v1037_v34, %v846_v16  ;;  %v763_v36 = vpop.f32.mrb[29].mxu1 }
 0x427   :  { %v764_v37 = vadd.f32 %v846_v16, %v763_v36  ;;  %v1038_v38 = vpop.f32.mrb[30].mxu1 }
 0x428   :  { %792 = vst [vmem:[#allocation10 + $0x70] sm:$0xff] %v772_v35  ;;  %v775_v39 = vadd.f32 %v1038_v38, %v846_v16  ;;  %v766_v40 = vpop.f32.mrb[31].mxu1 }
 0x429   :  { %790 = vst [vmem:[#allocation10 + $0x60] sm:$0xff] %v764_v37  ;;  %v767_v41 = vadd.f32 %v846_v16, %v766_v40 }
 0x42a   :  { %793 = vst [vmem:[#allocation10 + $0x78] sm:$0xff] %v775_v39 }
 0x42b   :  { %791 = vst [vmem:[#allocation10 + $0x68] sm:$0xff] %v767_v41 }
 0x42c   :  { %1179 = shalt.err (!%p1176_p8)
}
 0x42d   :  { %s1180_s26 = scalar_lea.hbm %s1372_s6, 2048 }
 0x42e   :  { %p1181_p9 = scmp.ne.s32.totalorder %s1372_s6, %s1180_s26  ;;  %p1184_p10 = scmp.lt.u32.totalorder %s1180_s26, %s1372_s6 }
 0x430   :  { %p1186_p11 = pnand %p1184_p10, %p1181_p9 }
 0x432   :  { %1189 = shalt.err (!%p1186_p11)
}
 0x433   :  { %s1205_s7 = smov 128   ;;  %s1206_s8 = smov 8  }
 0x434   :  { %805 = dma.vmem_to_hbm [thread:$0]  %s800_s21, 2048, %s1372_s6, [#allocation4], %s1205_s7, %s1205_s7, %s1206_s8  }
 0x435   :  { %1196 = dma.done.wait [#allocation4], 2048  }
 0x436   :  { %1197 = vsyncadd [#allocation4], 4294965248 }
 0x437   :  { %809 = vsyncpa [#allocation3], 1 }
 0x438   :  { %810 = vsyncpa [#allocation6], 1 }
 0x439   :  { %811 = vsyncpa [#allocation9], 1 }
 0x43a   :  { %812 = vsyncpa [#allocation4], 1 }

</bundles_post_ra>
